<compile_context>
chip_gen: v5e
topology: v5e:2x2
jax: 0.10.0
libtpu: 0.0.40
codegen_flags: <defaults>
</compile_context>

<pallas_src>
import functools
import math

import jax
import jax.numpy as jnp
from jax.experimental import pallas as pl
from jax.experimental.pallas import tpu as pltpu

_LOG2 = math.log(2.0)
_LANES = 128


def _round_up(x: int, m: int) -> int:
    return -(-x // m) * m


def _vmem_limit_bytes() -> int:
    """Explicit VMEM budget: half of physical, capped at 64 MiB (safe fallback 32 MiB)."""
    try:
        cap = int(pltpu.get_tpu_info().vmem_capacity_bytes)
        return max(16 << 20, min(cap // 2, 64 << 20))
    except Exception:
        # 32 MiB is safe on every generation (v7x has 64 MiB physical per TC).
        return 32 << 20


def _default_num_parallel() -> int:
    """>1 only on devices that expose multiple TensorCores (v7x); else 1."""
    try:
        dev = jax.devices()[0]
        n = getattr(dev, "num_cores", None)
        if isinstance(n, int) and n > 1:
            return min(int(n), 8)
        if "v7" in str(getattr(dev, "device_kind", "")).lower():
            return 2
    except Exception:
        pass
    return 1


def _log_cosh_sum_kernel(yp_ref, yt_ref, out_ref, *, rows, block_rows, inner,
                         needs_mask):
    """Accumulate lane-dense partial sums of log-cosh(y_pred - y_true)."""
    p = pl.program_id(0)   # "parallel" outer axis (per-core partial sums)
    j = pl.program_id(1)   # "arbitrary" reduction axis

    @pl.when(j == 0)
    def _():
        out_ref[...] = jnp.zeros_like(out_ref)

    x = yp_ref[...].astype(jnp.float32) - yt_ref[...].astype(jnp.float32)
    ax = jnp.abs(x)
    # log(cosh(x)) = |x| + log1p(exp(-2|x|)) - log(2)   (stable; exp + log1p only)
    # TODO(synk): on v7x with bf16 inputs, if xprof shows the EUP slot saturating,
    # replace log1p(t), t = exp(-2|x|) in (0, 1], with a short VPU polynomial.
    lc = ax + jnp.log1p(jnp.exp(-2.0 * ax)) - jnp.float32(_LOG2)

    def _accumulate(vals):
        # Block-local reduce to a lane-dense (1, 8, 128) tile, then a single VPU
        # add into the resident accumulator (cross-lane reduce happens once, in
        # the wrapper).
        out_ref[...] += vals.reshape(-1, 8, _LANES).sum(axis=0, keepdims=True)

    if needs_mask:
        blk = p * inner + j                       # unclamped logical block index
        row_end = (blk + 1) * block_rows

        # Fast path: fully in-bounds block — no iota/compare/select at all.
        @pl.when(row_end <= rows)
        def _():
            _accumulate(lc)

        # Slow path: only the partial edge block and duplicate (clamped) blocks.
        @pl.when(row_end > rows)
        def _():
            row0 = blk * block_rows
            row_idx = row0 + jax.lax.broadcasted_iota(jnp.int32, (lc.shape[0], 1), 0)
            # Keep this a true select: OOB-padded rows may hold NaN/Inf garbage.
            _accumulate(jnp.where(row_idx < rows, lc, jnp.float32(0.0)))
    else:
        _accumulate(lc)


def _log_cosh_sum_elems(y_pred, y_true):
    """Pure-JAX sum of log-cosh over all elements (used for tails / tiny inputs)."""
    x = y_pred.astype(jnp.float32) - y_true.astype(jnp.float32)
    ax = jnp.abs(x)
    return jnp.sum(ax + jnp.log1p(jnp.exp(-2.0 * ax)) - jnp.float32(_LOG2))


def log_cosh_loss_pallas(y_pred: jax.Array, y_true: jax.Array,
                         block_rows: int | None = None,
                         num_parallel: int | None = None) -> jax.Array:
    """log-cosh loss via a Pallas TPU streaming-reduction kernel."""
    assert y_pred.shape == y_true.shape
    n = y_pred.size

    fp = y_pred.reshape(-1)                      # keep native dtype (no upcast)
    ft = y_true.reshape(-1)

    rows = n // _LANES                           # full 128-lane rows
    tail_n = n - rows * _LANES                   # <128 leftover elements

    # Sublane granularity of the block for the (packed) input dtype.
    itemsize = min(jnp.dtype(y_pred.dtype).itemsize, jnp.dtype(y_true.dtype).itemsize)
    gran = max(8, 32 // itemsize)                # 8 (f32), 16 (bf16), 32 (int8/fp8)

    if rows < gran:
        # Too small to tile sensibly; kernel launch not worth it.
        return _log_cosh_sum_elems(fp, ft) / jnp.float32(n)

    vmem_limit = _vmem_limit_bytes()
    if block_rows is None:
        # ~vmem_limit/16 bytes of f32 working set per block: 8192 rows (4 MiB) on
        # 128-MiB chips (v5e/v6e), 4096 rows (2 MiB) on v7x / unknown chips.
        # Inputs stream in native dtype, so HBM bytes/step shrink further for
        # bf16/int8 while the in-VMEM f32 temp footprint stays bounded.
        block_rows = max(1024, min(8192, (vmem_limit // 16) // (4 * _LANES)))
    blk_rows = min(_round_up(block_rows, gran), (rows // gran) * gran)
    num_blocks = -(-rows // blk_rows)

    # Outer "parallel" axis: 1 on single-TC chips, #cores on multi-TC (v7x).
    # TODO(synk): verify "parallel" shards across both v7x TensorCores; if not,
    # switch this axis to pltpu.CORE_PARALLEL.
    P_req = num_parallel if num_parallel is not None else _default_num_parallel()
    P = min(max(1, P_req), num_blocks)
    inner = -(-num_blocks // P)
    needs_mask = (P * inner * blk_rows) != rows

    bulk_p = fp[: rows * _LANES].reshape(rows, _LANES)
    bulk_t = ft[: rows * _LANES].reshape(rows, _LANES)

    if P * inner == num_blocks:
        def in_map(p, j):
            return (p * inner + j, 0)
    else:
        def in_map(p, j):
            # Clamp the (duplicate) overhang block of an uneven split; its
            # contribution is zeroed by the in-kernel edge-block mask.
            return (jnp.minimum(p * inner + j, num_blocks - 1), 0)

    kernel = functools.partial(
        _log_cosh_sum_kernel,
        rows=rows, block_rows=blk_rows, inner=inner, needs_mask=needs_mask)

    partial_sums = pl.pallas_call(
        kernel,
        out_shape=jax.ShapeDtypeStruct((P, 8, _LANES), jnp.float32),
        grid_spec=pltpu.PrefetchScalarGridSpec(
            num_scalar_prefetch=0,
            grid=(P, inner),
            in_specs=[
                pl.BlockSpec((blk_rows, _LANES), in_map),
                pl.BlockSpec((blk_rows, _LANES), in_map),
            ],
            out_specs=pl.BlockSpec((1, 8, _LANES), lambda p, j: (p, 0, 0)),
        ),
        compiler_params=pltpu.CompilerParams(
            dimension_semantics=("parallel", "arbitrary"),
            vmem_limit_bytes=vmem_limit),
    )(bulk_p, bulk_t)

    total = jnp.sum(partial_sums)                # single cross-lane reduce
    if tail_n:
        total = total + _log_cosh_sum_elems(fp[rows * _LANES:], ft[rows * _LANES:])
    return total / jnp.float32(n)


def log_cosh_loss(y_pred: jax.Array, y_true: jax.Array,
                  size_threshold: int = 1 << 17) -> jax.Array:
    """Dispatcher: tiny inputs use the fused pure-JAX path, large use the kernel."""
    if y_pred.size < size_threshold:
        return _log_cosh_sum_elems(y_pred.reshape(-1), y_true.reshape(-1)) \
            / jnp.float32(y_pred.size)
    return log_cosh_loss_pallas(y_pred, y_true)


def _log_cosh_loss_ref(y_pred, y_true):
    x = y_pred.astype(jnp.float32) - y_true.astype(jnp.float32)
    return jnp.mean(x + jax.nn.softplus(-2.0 * x) - _LOG2)


if __name__ == "__main__":
    key = jax.random.PRNGKey(0)
    k1, k2, k3, k4, k5, k6 = jax.random.split(key, 6)

    # Main case: NCHW-like regression tensors (tiles exactly to (16, 128)).
    y_pred = jax.random.normal(k1, (2, 4, 16, 16), dtype=jnp.float32)
    y_true = jax.random.normal(k2, (2, 4, 16, 16), dtype=jnp.float32)
    loss = jax.block_until_ready(log_cosh_loss_pallas(y_pred, y_true))
    ref = jax.block_until_ready(_log_cosh_loss_ref(y_pred, y_true))
    assert loss.shape == (), f"expected scalar, got {loss.shape}"
    assert jnp.allclose(loss, ref, atol=1e-5, rtol=1e-5), (loss, ref)

    # Second case: exercises the gated edge-block mask, a 2-way parallel outer
    # axis, and the <128-element pure-JAX tail.
    yp2 = jax.random.normal(k3, (3, 823), dtype=jnp.float32)   # 2469 elements
    yt2 = jax.random.normal(k4, (3, 823), dtype=jnp.float32)
    loss2 = jax.block_until_ready(log_cosh_loss_pallas(yp2, yt2, num_parallel=2))
    ref2 = jax.block_until_ready(_log_cosh_loss_ref(yp2, yt2))
    assert jnp.allclose(loss2, ref2, atol=1e-5, rtol=1e-5), (loss2, ref2)

    # Third case: native bf16 streaming (no wrapper upcast), exact (8,128) tiling.
    yp3 = jax.random.normal(k5, (8, 32, 128), dtype=jnp.bfloat16)
    yt3 = jax.random.normal(k6, (8, 32, 128), dtype=jnp.bfloat16)
    loss3 = jax.block_until_ready(log_cosh_loss_pallas(yp3, yt3))
    ref3 = jax.block_until_ready(_log_cosh_loss_ref(yp3, yt3))
    assert jnp.allclose(loss3, ref3, atol=1e-4, rtol=1e-4), (loss3, ref3)

    print("KERNEL_OK")
</pallas_src>

<mosaic_0001>
module attributes {stable_mosaic.version = 11 : i64} {
  func.func @_log_cosh_sum_kernel(%arg0: i32, %arg1: i32, %arg2: memref<16x128xf32, #tpu.memory_space<vmem>>, %arg3: memref<16x128xf32, #tpu.memory_space<vmem>>, %arg4: memref<1x8x128xf32, #tpu.memory_space<vmem>>) attributes {dimension_semantics = [#tpu.dimension_semantics<parallel>, #tpu.dimension_semantics<arbitrary>], iteration_bounds = array<i64: 1, 1>, scalar_prefetch = 0 : i64, scratch_operands = 0 : i64, tpu.core_type = #tpu.core_type<tc>, window_params = [{transform_indices = @transform_0, window_bounds = array<i64: 16, 128>}, {transform_indices = @transform_1, window_bounds = array<i64: 16, 128>}, {transform_indices = @transform_2, window_bounds = array<i64: 1, 8, 128>}]} {
    %c0_i32 = arith.constant 0 : i32
    %0 = arith.cmpi eq, %arg1, %c0_i32 : i32
    %1 = arith.extui %0 : i1 to i32
    %c0_i32_0 = arith.constant 0 : i32
    %2 = arith.cmpi ne, %1, %c0_i32_0 : i32
    scf.if %2 {
      %cst_12 = arith.constant 0.000000e+00 : f32
      %20 = vector.broadcast %cst_12 : f32 to vector<1x8x128xf32>
      %c0_13 = arith.constant 0 : index
      %c0_14 = arith.constant 0 : index
      %c0_15 = arith.constant 0 : index
      %21 = vector.load %arg4[%c0_13, %c0_14, %c0_15] : memref<1x8x128xf32, #tpu.memory_space<vmem>>, vector<1x8x128xf32>
      tpu.vector_store %arg4[%c0_13, %c0_14, %c0_15], %20 {strides = array<i32>} : memref<1x8x128xf32, #tpu.memory_space<vmem>>, vector<1x8x128xf32>,
    } else {
    }
    %c0 = arith.constant 0 : index
    %c0_1 = arith.constant 0 : index
    %3 = vector.load %arg2[%c0, %c0_1] : memref<16x128xf32, #tpu.memory_space<vmem>>, vector<16x128xf32>
    %c0_2 = arith.constant 0 : index
    %c0_3 = arith.constant 0 : index
    %4 = vector.load %arg3[%c0_2, %c0_3] : memref<16x128xf32, #tpu.memory_space<vmem>>, vector<16x128xf32>
    %5 = arith.subf %3, %4 : vector<16x128xf32>
    %6 = math.absf %5 : vector<16x128xf32>
    %cst = arith.constant -2.000000e+00 : f32
    %7 = vector.broadcast %cst : f32 to vector<16x128xf32>
    %8 = arith.mulf %7, %6 : vector<16x128xf32>
    %9 = math.exp %8 : vector<16x128xf32>
    %10 = math.log1p %9 : vector<16x128xf32>
    %11 = arith.addf %6, %10 : vector<16x128xf32>
    %cst_4 = arith.constant 0.693147182 : f32
    %12 = vector.broadcast %cst_4 : f32 to vector<16x128xf32>
    %13 = arith.subf %11, %12 : vector<16x128xf32>
    %c0_5 = arith.constant 0 : index
    %c0_6 = arith.constant 0 : index
    %c0_7 = arith.constant 0 : index
    %14 = vector.load %arg4[%c0_5, %c0_6, %c0_7] : memref<1x8x128xf32, #tpu.memory_space<vmem>>, vector<1x8x128xf32>
    %15 = vector.shape_cast %13 : vector<16x128xf32> to vector<2x8x128xf32>
    %cst_8 = arith.constant dense<0.000000e+00> : vector<8x128xf32>
    %16 = vector.multi_reduction <add>, %15, %cst_8 [0] : vector<2x8x128xf32> to vector<8x128xf32>
    %17 = vector.shape_cast %16 : vector<8x128xf32> to vector<1x8x128xf32>
    %18 = arith.addf %14, %17 : vector<1x8x128xf32>
    %c0_9 = arith.constant 0 : index
    %c0_10 = arith.constant 0 : index
    %c0_11 = arith.constant 0 : index
    %19 = vector.load %arg4[%c0_9, %c0_10, %c0_11] : memref<1x8x128xf32, #tpu.memory_space<vmem>>, vector<1x8x128xf32>
    tpu.vector_store %arg4[%c0_9, %c0_10, %c0_11], %18 {strides = array<i32>} : memref<1x8x128xf32, #tpu.memory_space<vmem>>, vector<1x8x128xf32>,
    return
  }
  func.func @transform_0(%arg0: i32, %arg1: i32) -> (i32, i32) {
    %c1_i32 = arith.constant 1 : i32
    %0 = arith.muli %arg0, %c1_i32 : i32
    %1 = arith.addi %0, %arg1 : i32
    %c0_i32 = arith.constant 0 : i32
    %c0_i32_0 = arith.constant 0 : i32
    return %1, %c0_i32 : i32, i32
  }
  func.func @transform_1(%arg0: i32, %arg1: i32) -> (i32, i32) {
    %c1_i32 = arith.constant 1 : i32
    %0 = arith.muli %arg0, %c1_i32 : i32
    %1 = arith.addi %0, %arg1 : i32
    %c0_i32 = arith.constant 0 : i32
    %c0_i32_0 = arith.constant 0 : i32
    return %1, %c0_i32 : i32, i32
  }
  func.func @transform_2(%arg0: i32, %arg1: i32) -> (i32, i32, i32) {
    %c0_i32 = arith.constant 0 : i32
    %c0_i32_0 = arith.constant 0 : i32
    %c0_i32_1 = arith.constant 0 : i32
    return %arg0, %c0_i32, %c0_i32_0 : i32, i32, i32
  }
}

</mosaic_0001>

<bundles_post_ra>
// kernel: tpu_custom_call.1
= control target key start
LH: loop header
LB: loop body
LE: loop exit
PB: predicated region body
PF: predicated region fallthrough
CT: control target
= control target key end

     0   :  { %7 = vsyncpa [#allocation3], 0  ;;  %s242_s0 = inlined_call_operand.hbm [shape: f32[16,128], index: 0, kind: input, shape index: {}]   ;;  %s243_s1 = inlined_call_operand.hbm [shape: f32[16,128], index: 1, kind: input, shape index: {}]   ;;  %s244_s2 = inlined_call_operand.hbm [shape: f32[1,8,128], index: 2, kind: output, shape index: {}]  }
   0x1   :  { %8 = vsyncpa [#allocation6], 0 }
   0x2   :  { %9 = vsyncpa [#allocation4], 0  ;;  %s18_s11 = sshll.u32 %s242_s0, 4  ;;  %s213_s12 = smov [#allocation2]   ;;  %s19_s11 = int_to_ptr.hbm [resolvable:$true] %s18_s11 }
   0x3   :  { %s20_s13 = sshll.u32 %s213_s12, 4  ;;  %s35_s16 = sshll.u32 %s243_s1, 4  ;;  %s21_s13 = int_to_ptr.vmem [resolvable:$true] %s20_s13  ;;  %s36_s16 = int_to_ptr.hbm [resolvable:$true] %s35_s16 }
   0x4   :  { %s214_s17 = smov 128   ;;  %s215_s18 = smov 8  }
   0x5   :  { %26 = dma.hbm_to_vmem [thread:$0]  %s19_s11, 256, %s21_s13, [#allocation3], %s214_s17, %s214_s17, %s215_s18  }
   0x6   :  { %s216_s19 = smov [#allocation5]  }
   0x7   :  { %s37_s20 = sshll.u32 %s216_s19, 4  ;;  %s38_s20 = int_to_ptr.vmem [resolvable:$true] %s37_s20 }
   0x8   :  { %43 = dma.hbm_to_vmem [thread:$0]  %s36_s16, 256, %s38_s20, [#allocation6], %s214_s17, %s214_s17, %s215_s18  }
   0x9   :  { %207 = dma.done.wait [#allocation3], 256  }
   0xa   :  { %208 = vsyncadd [#allocation3], 4294967040 }
   0xb   :  { %209 = dma.done.wait [#allocation6], 256  }
   0xc   :  { %210 = vsyncadd [#allocation6], 4294967040  ;;  %v61_v0 = vld [vmem:[#allocation2] sm:$0xff]  ;;  %v62_v1 = vld [vmem:[#allocation2 + $0x8] sm:$0xff]  ;;  %s217_s0 = smov [#allocation7]   ;;  %s108_s23 = sshll.u32 %s244_s2, 4  ;;  %s109_s23 = int_to_ptr.hbm [resolvable:$true] %s108_s23 }
   0xd   :  { %v63_v2 = vld [vmem:[#allocation5] sm:$0xff]  ;;  %v64_v3 = vld [vmem:[#allocation5 + $0x8] sm:$0xff]  ;;  %s106_s1 = sshll.u32 %s217_s0, 4  ;;  %s107_s1 = int_to_ptr.vmem [resolvable:$true] %s106_s1 }
   0xe   :  { %v65_v4 = vsub.f32 %v61_v0, %v63_v2  ;;  %v66_v5 = vsub.f32 %v62_v1, %v64_v3 }
  0x10   :  { %v67_v6 = vand.u32 2147483647, %v65_v4  ;;  %v68_v7 = vand.u32 2147483647, %v66_v5 }
  0x12   :  { %v69_v8 = vmul.f32 -2.0, %v67_v6  ;;  %v70_v9 = vmul.f32 -2.0, %v68_v7 }
  0x14   :  { %v71_v10 = vmul.f32 1.442695, %v69_v8  ;;  %v73_v11 = vmul.f32 1.442695, %v70_v9 }
  0x16   :  { %127 = vpow2.f32 %v71_v10 }
  0x17   :  { %129 = vpow2.f32 %v73_v11 }
  0x1c   :  { %v128_v12 = vpop.eup %127 }
  0x1d   :  { %v130_v13 = vpop.eup %129  ;;  %v75_v14 = vadd.f32 1.0, %v128_v12  ;;  %v78_v15 = vmul.f32 -0.5, %v128_v12  ;;  %v81_v19 = vand.u32 2147483647, %v128_v12 }
  0x1e   :  { %v84_v16 = vadd.f32 1.0, %v130_v13  ;;  %v87_v17 = vmul.f32 -0.5, %v130_v13  ;;  %v90_v21 = vand.u32 2147483647, %v130_v13 }
  0x1f   :  { %131 = vlog2.f32 %v75_v14  ;;  %v79_v18 = vadd.f32 1.0, %v78_v15  ;;  %vm82_vm0 = vcmp.lt.f32.partialorder %v81_v19, 0.0004427343 }
  0x20   :  { %133 = vlog2.f32 %v84_v16  ;;  %v88_v20 = vadd.f32 1.0, %v87_v17  ;;  %vm91_vm1 = vcmp.lt.f32.partialorder %v90_v21, 0.0004427343 }
  0x21   :  { %v80_v22 = vmul.f32 %v128_v12, %v79_v18 }
  0x22   :  { %v89_v24 = vmul.f32 %v130_v13, %v88_v20 }
  0x25   :  { %v132_v23 = vpop.eup %131 }
  0x26   :  { %v134_v25 = vpop.eup %133  ;;  %v77_v26 = vmul.f32 0.6931472, %v132_v23 }
  0x27   :  { %v86_v27 = vmul.f32 0.6931472, %v134_v25 }
  0x28   :  { %v83_v28 = vsel %vm82_vm0, %v80_v22, %v77_v26 }
  0x29   :  { %v92_v29 = vsel %vm91_vm1, %v89_v24, %v86_v27  ;;  %v93_v30 = vadd.f32 %v83_v28, %v67_v6 }
  0x2a   :  { %v94_v31 = vadd.f32 %v92_v29, %v68_v7 }
  0x2b   :  { %v119_v32 = vadd.f32 -0.6931472, %v93_v30 }
  0x2c   :  { %v120_v33 = vadd.f32 -0.6931472, %v94_v31 }
  0x2e   :  { %v98_v34 = vadd.f32 %v120_v33, %v119_v32 }
  0x30   :  { %100 = vst [vmem:[#allocation7] sm:$0xff] %v98_v34 }
  0x31   :  { %111 = dma.vmem_to_hbm [thread:$0]  %s107_s1, 128, %s109_s23, [#allocation4]  }
  0x32   :  { %211 = dma.done.wait [#allocation4], 128  }
  0x33   :  { %212 = vsyncadd [#allocation4], 4294967168 }
  0x34   :  { %116 = vsyncpa [#allocation3], 1 }
  0x35   :  { %117 = vsyncpa [#allocation6], 1 }
  0x36   :  { %118 = vsyncpa [#allocation4], 1 }

</bundles_post_ra>
